<compile_context>
chip_gen: v7x
topology: tpu7x:2x2x1
jax: 0.10.0
libtpu: 0.0.40
codegen_flags: <defaults>
</compile_context>

<pallas_src>
import functools

import jax
import jax.numpy as jnp
from jax import lax
from jax.experimental import pallas as pl
from jax.experimental.pallas import tpu as pltpu


def _textcnn_kernel(ids_ref, pos_ref, len_ref, table_ref, w_ref, b_ref,
                    out_ref, mask_ref, *, seq_len):
    """All refs hold full arrays (single grid step).

    ids_ref / pos_ref / len_ref : [B*S, 1] int32   (token id, in-sequence position, seq length)
    table_ref                   : [V, E]  f32      (embedding table, pad row is zero)
    w_ref                       : [K, E, O] f32    (Conv1d weight, tap-major, pre-transposed)
    b_ref                       : [1, O]  f32
    out_ref                     : [B*S, O] f32     (lane-dense output slab)
    mask_ref                    : [B*S, 1] f32     (unpadding mask)
    """
    BS = ids_ref.shape[0]
    V, _ = table_ref.shape
    K = w_ref.shape[0]
    pad = (K - 1) // 2

    # ---- embedding lookup as a single one-hot matmul (MXU) -----------------
    ids = ids_ref[...]                                            # [BS, 1] int32
    vocab_iota = lax.broadcasted_iota(jnp.int32, (1, V), 1)       # [1, V]
    one_hot = (ids == vocab_iota).astype(jnp.float32)             # [BS, V]
    emb = jnp.dot(one_hot, table_ref[...],
                  preferred_element_type=jnp.float32)             # [BS, E]
    # TODO(synk): embedding / encoder dropout layers are evaluated in eval mode (identity).

    pos = pos_ref[...]                                            # [BS, 1] int32
    row_i = lax.broadcasted_iota(jnp.int32, (BS, BS), 0)
    col_i = lax.broadcasted_iota(jnp.int32, (BS, BS), 1)

    # ---- Conv1d over the sequence: K shifted matmuls, accumulated in f32 ---
    acc = None
    for j in range(K):                                            # K is small & static
        d = j - pad
        if d == 0:
            src = emb
        else:
            # shift rows by d via a tiny 0/1 permutation matmul; rows falling off
            # the array end become zero (== Conv1d zero-padding), rows that would
            # cross a sequence boundary are zeroed by the `valid` mask below.
            perm = (col_i == row_i + d).astype(jnp.float32)       # [BS, BS]
            shifted = jnp.dot(perm, emb,
                              preferred_element_type=jnp.float32)  # [BS, E]
            sp = pos + d
            valid = jnp.logical_and(sp >= 0, sp < seq_len).astype(jnp.float32)
            src = shifted * valid
        contrib = jnp.dot(src, w_ref[j],
                          preferred_element_type=jnp.float32)     # [BS, O]
        acc = contrib if acc is None else acc + contrib

    y = jnp.maximum(acc + b_ref[...], 0.0)                        # bias + ReLU

    # ---- unpadding mask + masked output ------------------------------------
    mask = (pos < len_ref[...]).astype(jnp.float32)               # [BS, 1]
    out_ref[...] = (y * mask).astype(out_ref.dtype)
    mask_ref[...] = mask


def textcnn_encoder(ids, lengths, params):
    """ids: [B, S] int32 token ids; lengths: [B] int32 valid lengths.

    params:
      embedding   [V, E] f32   (row at padding index is zero)
      conv_weight [O, E, K] f32 (PyTorch nn.Conv1d layout)
      conv_bias   [O] f32
    """
    B, S = ids.shape
    V, E = params["embedding"].shape
    O, _, K = params["conv_weight"].shape
    BS = B * S

    # --- wrapper-side layout plumbing (free: folded by XLA) ------------------
    ids_col = ids.reshape(BS, 1).astype(jnp.int32)
    pos_col = jnp.tile(jnp.arange(S, dtype=jnp.int32), B).reshape(BS, 1)
    len_col = jnp.repeat(lengths.astype(jnp.int32), S).reshape(BS, 1)
    w_taps = jnp.transpose(params["conv_weight"], (2, 1, 0))       # [K, E, O]
    bias = params["conv_bias"].reshape(1, O).astype(jnp.float32)
    table = params["embedding"].astype(jnp.float32)

    kernel = functools.partial(_textcnn_kernel, seq_len=S)

    out_flat, mask_flat = pl.pallas_call(
        kernel,
        out_shape=(jax.ShapeDtypeStruct((BS, O), jnp.float32),
                   jax.ShapeDtypeStruct((BS, 1), jnp.float32)),
        grid_spec=pltpu.PrefetchScalarGridSpec(
            num_scalar_prefetch=0,
            grid=(1,),                       # whole problem in one step: no per-step overhead
            in_specs=[
                pl.BlockSpec((BS, 1), lambda i: (0, 0)),        # ids
                pl.BlockSpec((BS, 1), lambda i: (0, 0)),        # positions
                pl.BlockSpec((BS, 1), lambda i: (0, 0)),        # lengths (per row)
                pl.BlockSpec((V, E), lambda i: (0, 0)),         # embedding table
                pl.BlockSpec((K, E, O), lambda i: (0, 0, 0)),   # conv taps [K, E, O]
                pl.BlockSpec((1, O), lambda i: (0, 0)),         # conv bias
            ],
            out_specs=[
                pl.BlockSpec((BS, O), lambda i: (0, 0)),        # lane-dense output
                pl.BlockSpec((BS, 1), lambda i: (0, 0)),        # unpadding mask
            ],
        ),
        compiler_params=pltpu.CompilerParams(
            dimension_semantics=("arbitrary",)),
    )(ids_col, pos_col, len_col, table, w_taps, bias)

    return out_flat.reshape(B, S, O), mask_flat.reshape(B, S)


def _reference(ids, lengths, params):
    """Pure-JAX reference mirroring the PyTorch forward (eval mode)."""
    B, S = ids.shape
    O, _, K = params["conv_weight"].shape
    pad = (K - 1) // 2

    emb = params["embedding"][ids]                                 # [B, S, E]
    xp = jnp.pad(emb, ((0, 0), (pad, pad), (0, 0)))                # Conv1d zero padding
    y = jnp.zeros((B, S, O), jnp.float32) + params["conv_bias"]
    for j in range(K):
        y = y + jnp.einsum("bse,oe->bso", xp[:, j:j + S, :],
                           params["conv_weight"][:, :, j],
                           precision=jax.lax.Precision.HIGHEST)
    y = jnp.maximum(y, 0.0)                                        # ReLU
    mask = (jnp.arange(S)[None, :] < lengths[:, None]).astype(jnp.float32)
    return y * mask[..., None], mask


if __name__ == "__main__":
    B, S = 2, 8            # batch, sequence length
    V, E = 64, 32          # vocab size, embedding dim
    K, O = 3, 128          # conv kernel_size, kernel_num (hidden_dimension)
    PAD_IDX = 0

    key = jax.random.PRNGKey(0)
    k_ids, k_emb, k_w, k_b = jax.random.split(key, 4)

    lengths = jnp.array([8, 5], dtype=jnp.int32)
    raw_ids = jax.random.randint(k_ids, (B, S), 1, V, dtype=jnp.int32)
    positions = jnp.arange(S, dtype=jnp.int32)[None, :]
    ids = jnp.where(positions < lengths[:, None], raw_ids, PAD_IDX)

    emb_table = (0.1 * jax.random.normal(k_emb, (V, E))).astype(jnp.float32)
    emb_table = emb_table.at[PAD_IDX].set(0.0)        # nn.Embedding(padding_idx=...)
    conv_w = (0.1 * jax.random.normal(k_w, (O, E, K))).astype(jnp.float32)
    conv_b = (0.1 * jax.random.normal(k_b, (O,))).astype(jnp.float32)

    params = {"embedding": emb_table, "conv_weight": conv_w, "conv_bias": conv_b}

    out, mask = textcnn_encoder(ids, lengths, params)
    out = jax.block_until_ready(out)
    mask = jax.block_until_ready(mask)

    ref_out, ref_mask = _reference(ids, lengths, params)
    assert out.shape == (B, S, O) and mask.shape == (B, S)
    assert jnp.array_equal(mask, ref_mask), "mask mismatch vs reference"
    assert jnp.allclose(out, ref_out, atol=2e-3, rtol=2e-3), "output mismatch vs reference"

    print("KERNEL_OK")
</pallas_src>

<mosaic_0001>
module attributes {stable_mosaic.version = 11 : i64} {
  func.func @_textcnn_kernel(%arg0: i32, %arg1: memref<16x1xi32, #tpu.memory_space<vmem>>, %arg2: memref<16x1xi32, #tpu.memory_space<vmem>>, %arg3: memref<16x1xi32, #tpu.memory_space<vmem>>, %arg4: memref<64x32xf32, #tpu.memory_space<vmem>>, %arg5: memref<3x32x128xf32, #tpu.memory_space<vmem>>, %arg6: memref<1x128xf32, #tpu.memory_space<vmem>>, %arg7: memref<16x128xf32, #tpu.memory_space<vmem>>, %arg8: memref<16x1xf32, #tpu.memory_space<vmem>>) attributes {dimension_semantics = [#tpu.dimension_semantics<arbitrary>], iteration_bounds = array<i64: 1>, scalar_prefetch = 0 : i64, scratch_operands = 0 : i64, tpu.core_type = #tpu.core_type<tc>, window_params = [{pipeline_mode = #tpu.pipeline_mode<synchronous>, transform_indices = @transform_0, window_bounds = array<i64: 16, 1>}, {pipeline_mode = #tpu.pipeline_mode<synchronous>, transform_indices = @transform_1, window_bounds = array<i64: 16, 1>}, {pipeline_mode = #tpu.pipeline_mode<synchronous>, transform_indices = @transform_2, window_bounds = array<i64: 16, 1>}, {pipeline_mode = #tpu.pipeline_mode<synchronous>, transform_indices = @transform_3, window_bounds = array<i64: 64, 32>}, {pipeline_mode = #tpu.pipeline_mode<synchronous>, transform_indices = @transform_4, window_bounds = array<i64: 3, 32, 128>}, {pipeline_mode = #tpu.pipeline_mode<synchronous>, transform_indices = @transform_5, window_bounds = array<i64: 1, 128>}, {pipeline_mode = #tpu.pipeline_mode<synchronous>, transform_indices = @transform_6, window_bounds = array<i64: 16, 128>}, {pipeline_mode = #tpu.pipeline_mode<synchronous>, transform_indices = @transform_7, window_bounds = array<i64: 16, 1>}]} {
    %c0 = arith.constant 0 : index
    %c0_0 = arith.constant 0 : index
    %0 = vector.load %arg1[%c0, %c0_0] : memref<16x1xi32, #tpu.memory_space<vmem>>, vector<16x1xi32>
    %1 = tpu.iota {dimensions = array<i32: 1>} : vector<1x64xi32>
    %2 = vector.broadcast %0 : vector<16x1xi32> to vector<16x64xi32>
    %3 = vector.broadcast %1 : vector<1x64xi32> to vector<16x64xi32>
    %4 = arith.cmpi eq, %2, %3 : vector<16x64xi32>
    %5 = arith.extui %4 : vector<16x64xi1> to vector<16x64xi32>
    %6 = arith.sitofp %5 : vector<16x64xi32> to vector<16x64xf32>
    %c0_1 = arith.constant 0 : index
    %c0_2 = arith.constant 0 : index
    %7 = vector.load %arg4[%c0_1, %c0_2] : memref<64x32xf32, #tpu.memory_space<vmem>>, vector<64x32xf32>
    %cst = arith.constant dense<0.000000e+00> : vector<16x32xf32>
    %8 = tpu.matmul %6, %7, %cst {dimension_numbers = #tpu.dot_dimension_numbers<[1], [0], [0], [1], [0, 0, 1, 1], [], []>} : vector<16x64xf32>, vector<64x32xf32>, vector<16x32xf32> -> vector<16x32xf32>
    %c0_3 = arith.constant 0 : index
    %c0_4 = arith.constant 0 : index
    %9 = vector.load %arg2[%c0_3, %c0_4] : memref<16x1xi32, #tpu.memory_space<vmem>>, vector<16x1xi32>
    %10 = tpu.iota {dimensions = array<i32: 0>} : vector<16x16xi32>
    %11 = tpu.iota {dimensions = array<i32: 1>} : vector<16x16xi32>
    %c-1_i32 = arith.constant -1 : i32
    %12 = vector.broadcast %c-1_i32 : i32 to vector<16x16xi32>
    %13 = arith.addi %10, %12 : vector<16x16xi32>
    %14 = arith.cmpi eq, %11, %13 : vector<16x16xi32>
    %15 = arith.extui %14 : vector<16x16xi1> to vector<16x16xi32>
    %16 = arith.sitofp %15 : vector<16x16xi32> to vector<16x16xf32>
    %cst_5 = arith.constant dense<0.000000e+00> : vector<16x32xf32>
    %17 = tpu.matmul %16, %8, %cst_5 {dimension_numbers = #tpu.dot_dimension_numbers<[1], [0], [0], [1], [0, 0, 1, 1], [], []>} : vector<16x16xf32>, vector<16x32xf32>, vector<16x32xf32> -> vector<16x32xf32>
    %c-1_i32_6 = arith.constant -1 : i32
    %18 = vector.broadcast %c-1_i32_6 : i32 to vector<16x1xi32>
    %19 = arith.addi %9, %18 : vector<16x1xi32>
    %c0_i32 = arith.constant 0 : i32
    %20 = vector.broadcast %c0_i32 : i32 to vector<16x1xi32>
    %21 = arith.cmpi sge, %19, %20 : vector<16x1xi32>
    %c8_i32 = arith.constant 8 : i32
    %22 = vector.broadcast %c8_i32 : i32 to vector<16x1xi32>
    %23 = arith.cmpi slt, %19, %22 : vector<16x1xi32>
    %24 = arith.andi %21, %23 : vector<16x1xi1>
    %25 = arith.extui %24 : vector<16x1xi1> to vector<16x1xi32>
    %26 = arith.sitofp %25 : vector<16x1xi32> to vector<16x1xf32>
    %27 = vector.broadcast %26 : vector<16x1xf32> to vector<16x32xf32>
    %28 = arith.mulf %17, %27 : vector<16x32xf32>
    %c0_7 = arith.constant 0 : index
    %c0_8 = arith.constant 0 : index
    %c0_9 = arith.constant 0 : index
    %29 = vector.load %arg5[%c0_7, %c0_8, %c0_9] : memref<3x32x128xf32, #tpu.memory_space<vmem>>, vector<1x32x128xf32>
    %30 = vector.shape_cast %29 : vector<1x32x128xf32> to vector<32x128xf32>
    %cst_10 = arith.constant dense<0.000000e+00> : vector<16x128xf32>
    %31 = tpu.matmul %28, %30, %cst_10 {dimension_numbers = #tpu.dot_dimension_numbers<[1], [0], [0], [1], [0, 0, 1, 1], [], []>} : vector<16x32xf32>, vector<32x128xf32>, vector<16x128xf32> -> vector<16x128xf32>
    %c1 = arith.constant 1 : index
    %c0_11 = arith.constant 0 : index
    %c0_12 = arith.constant 0 : index
    %32 = vector.load %arg5[%c1, %c0_11, %c0_12] : memref<3x32x128xf32, #tpu.memory_space<vmem>>, vector<1x32x128xf32>
    %33 = vector.shape_cast %32 : vector<1x32x128xf32> to vector<32x128xf32>
    %cst_13 = arith.constant dense<0.000000e+00> : vector<16x128xf32>
    %34 = tpu.matmul %8, %33, %cst_13 {dimension_numbers = #tpu.dot_dimension_numbers<[1], [0], [0], [1], [0, 0, 1, 1], [], []>} : vector<16x32xf32>, vector<32x128xf32>, vector<16x128xf32> -> vector<16x128xf32>
    %35 = arith.addf %31, %34 : vector<16x128xf32>
    %c1_i32 = arith.constant 1 : i32
    %36 = vector.broadcast %c1_i32 : i32 to vector<16x16xi32>
    %37 = arith.addi %10, %36 : vector<16x16xi32>
    %38 = arith.cmpi eq, %11, %37 : vector<16x16xi32>
    %39 = arith.extui %38 : vector<16x16xi1> to vector<16x16xi32>
    %40 = arith.sitofp %39 : vector<16x16xi32> to vector<16x16xf32>
    %cst_14 = arith.constant dense<0.000000e+00> : vector<16x32xf32>
    %41 = tpu.matmul %40, %8, %cst_14 {dimension_numbers = #tpu.dot_dimension_numbers<[1], [0], [0], [1], [0, 0, 1, 1], [], []>} : vector<16x16xf32>, vector<16x32xf32>, vector<16x32xf32> -> vector<16x32xf32>
    %c1_i32_15 = arith.constant 1 : i32
    %42 = vector.broadcast %c1_i32_15 : i32 to vector<16x1xi32>
    %43 = arith.addi %9, %42 : vector<16x1xi32>
    %c0_i32_16 = arith.constant 0 : i32
    %44 = vector.broadcast %c0_i32_16 : i32 to vector<16x1xi32>
    %45 = arith.cmpi sge, %43, %44 : vector<16x1xi32>
    %c8_i32_17 = arith.constant 8 : i32
    %46 = vector.broadcast %c8_i32_17 : i32 to vector<16x1xi32>
    %47 = arith.cmpi slt, %43, %46 : vector<16x1xi32>
    %48 = arith.andi %45, %47 : vector<16x1xi1>
    %49 = arith.extui %48 : vector<16x1xi1> to vector<16x1xi32>
    %50 = arith.sitofp %49 : vector<16x1xi32> to vector<16x1xf32>
    %51 = vector.broadcast %50 : vector<16x1xf32> to vector<16x32xf32>
    %52 = arith.mulf %41, %51 : vector<16x32xf32>
    %c2 = arith.constant 2 : index
    %c0_18 = arith.constant 0 : index
    %c0_19 = arith.constant 0 : index
    %53 = vector.load %arg5[%c2, %c0_18, %c0_19] : memref<3x32x128xf32, #tpu.memory_space<vmem>>, vector<1x32x128xf32>
    %54 = vector.shape_cast %53 : vector<1x32x128xf32> to vector<32x128xf32>
    %cst_20 = arith.constant dense<0.000000e+00> : vector<16x128xf32>
    %55 = tpu.matmul %52, %54, %cst_20 {dimension_numbers = #tpu.dot_dimension_numbers<[1], [0], [0], [1], [0, 0, 1, 1], [], []>} : vector<16x32xf32>, vector<32x128xf32>, vector<16x128xf32> -> vector<16x128xf32>
    %56 = arith.addf %35, %55 : vector<16x128xf32>
    %c0_21 = arith.constant 0 : index
    %c0_22 = arith.constant 0 : index
    %57 = vector.load %arg6[%c0_21, %c0_22] : memref<1x128xf32, #tpu.memory_space<vmem>>, vector<1x128xf32>
    %58 = vector.broadcast %57 : vector<1x128xf32> to vector<16x128xf32>
    %59 = arith.addf %56, %58 : vector<16x128xf32>
    %cst_23 = arith.constant 0.000000e+00 : f32
    %60 = vector.broadcast %cst_23 : f32 to vector<16x128xf32>
    %61 = arith.maximumf %59, %60 : vector<16x128xf32>
    %c0_24 = arith.constant 0 : index
    %c0_25 = arith.constant 0 : index
    %62 = vector.load %arg3[%c0_24, %c0_25] : memref<16x1xi32, #tpu.memory_space<vmem>>, vector<16x1xi32>
    %63 = arith.cmpi slt, %9, %62 : vector<16x1xi32>
    %64 = arith.extui %63 : vector<16x1xi1> to vector<16x1xi32>
    %65 = arith.sitofp %64 : vector<16x1xi32> to vector<16x1xf32>
    %66 = vector.broadcast %65 : vector<16x1xf32> to vector<16x128xf32>
    %67 = arith.mulf %61, %66 : vector<16x128xf32>
    %c0_26 = arith.constant 0 : index
    %c0_27 = arith.constant 0 : index
    %68 = vector.load %arg7[%c0_26, %c0_27] : memref<16x128xf32, #tpu.memory_space<vmem>>, vector<16x128xf32>
    tpu.vector_store %arg7[%c0_26, %c0_27], %67 {strides = array<i32>} : memref<16x128xf32, #tpu.memory_space<vmem>>, vector<16x128xf32>,
    %c0_28 = arith.constant 0 : index
    %c0_29 = arith.constant 0 : index
    %69 = vector.load %arg8[%c0_28, %c0_29] : memref<16x1xf32, #tpu.memory_space<vmem>>, vector<16x1xf32>
    tpu.vector_store %arg8[%c0_28, %c0_29], %65 {strides = array<i32>} : memref<16x1xf32, #tpu.memory_space<vmem>>, vector<16x1xf32>,
    return
  }
  func.func @transform_0(%arg0: i32) -> (i32, i32) {
    %c0_i32 = arith.constant 0 : i32
    %c0_i32_0 = arith.constant 0 : i32
    %c0_i32_1 = arith.constant 0 : i32
    return %c0_i32, %c0_i32_0 : i32, i32
  }
  func.func @transform_1(%arg0: i32) -> (i32, i32) {
    %c0_i32 = arith.constant 0 : i32
    %c0_i32_0 = arith.constant 0 : i32
    %c0_i32_1 = arith.constant 0 : i32
    return %c0_i32, %c0_i32_0 : i32, i32
  }
  func.func @transform_2(%arg0: i32) -> (i32, i32) {
    %c0_i32 = arith.constant 0 : i32
    %c0_i32_0 = arith.constant 0 : i32
    %c0_i32_1 = arith.constant 0 : i32
    return %c0_i32, %c0_i32_0 : i32, i32
  }
  func.func @transform_3(%arg0: i32) -> (i32, i32) {
    %c0_i32 = arith.constant 0 : i32
    %c0_i32_0 = arith.constant 0 : i32
    %c0_i32_1 = arith.constant 0 : i32
    return %c0_i32, %c0_i32_0 : i32, i32
  }
  func.func @transform_4(%arg0: i32) -> (i32, i32, i32) {
    %c0_i32 = arith.constant 0 : i32
    %c0_i32_0 = arith.constant 0 : i32
    %c0_i32_1 = arith.constant 0 : i32
    %c0_i32_2 = arith.constant 0 : i32
    return %c0_i32, %c0_i32_0, %c0_i32_1 : i32, i32, i32
  }
  func.func @transform_5(%arg0: i32) -> (i32, i32) {
    %c0_i32 = arith.constant 0 : i32
    %c0_i32_0 = arith.constant 0 : i32
    %c0_i32_1 = arith.constant 0 : i32
    return %c0_i32, %c0_i32_0 : i32, i32
  }
  func.func @transform_6(%arg0: i32) -> (i32, i32) {
    %c0_i32 = arith.constant 0 : i32
    %c0_i32_0 = arith.constant 0 : i32
    %c0_i32_1 = arith.constant 0 : i32
    return %c0_i32, %c0_i32_0 : i32, i32
  }
  func.func @transform_7(%arg0: i32) -> (i32, i32) {
    %c0_i32 = arith.constant 0 : i32
    %c0_i32_0 = arith.constant 0 : i32
    %c0_i32_1 = arith.constant 0 : i32
    return %c0_i32, %c0_i32_0 : i32, i32
  }
}

</mosaic_0001>

<bundles_post_ra>
// kernel: tpu_custom_call.1
= control target key start
LH: loop header
LB: loop body
LE: loop exit
PB: predicated region body
PF: predicated region fallthrough
CT: control target
= control target key end

     0   :  { %v913_v2 = vmov 0   ;;  %vm657_vm0 = vcmask 7168   ;;  %v914_v10 = vmov 0.0   ;;  %s1097_s0 = inlined_call_operand.vmem [shape: s32[16,1], index: 0, kind: input, shape index: {}]   ;;  %s1098_s1 = inlined_call_operand.vmem [shape: s32[16,1], index: 1, kind: input, shape index: {}]   ;;  %s1099_s2 = inlined_call_operand.vmem [shape: s32[16,1], index: 2, kind: input, shape index: {}]   ;;  %s1100_s3 = inlined_call_operand.vmem [shape: f32[64,32], index: 3, kind: input, shape index: {}]   ;;  %s1101_s4 = inlined_call_operand.vmem [shape: f32[3,32,128], index: 4, kind: input, shape index: {}]   ;;  %s1102_s5 = inlined_call_operand.vmem [shape: f32[1,128], index: 5, kind: input, shape index: {}]   ;;  %s1103_s6 = inlined_call_operand.hbm [shape: f32[16,128], index: 6, kind: output, shape index: {0}]   ;;  %s1104_s7 = inlined_call_operand.vmem [shape: f32[16,1], index: 7, kind: output, shape index: {1}]  }
   0x1   :  { %v26_v0 = vld [vmem:[%s1097_s0] sm:$0xff]  ;;  %872 = vset.pattern.permute.xlu0 %v913_v2  ;;  %v969_v3 = vld [vmem:[%s1098_s1 + $0x8] sm:$0xff]  ;;  %873 = vset.pattern.permute.xlu1 %v913_v2  ;;  %v44_v8 = vld [vmem:[%s1100_s3 + $0x10] sm:$0xff] }
   0x2   :  { %v964_v1 = vld [vmem:[%s1098_s1] sm:$0xff]  ;;  %v636_v5 = vld [vmem:[%s1099_s2 + $0x8] sm:$0xff]  ;;  %31 = vperm.xlu0 %872, %v26_v0   ;;  %v45_v14 = vld [vmem:[%s1100_s3 + $0x18] sm:$0xff] }
   0x3   :  { %v635_v4 = vld [vmem:[%s1099_s2] sm:$0xff]  ;;  %vm638_vm2 = vcmp.lt.s32.totalorder %v969_v3, %v636_v5  ;;  %v43_v7 = vld [vmem:[%s1100_s3 + $0x8] sm:$0xff]  ;;  %v819_v15 = vpack.c.bf16 %v45_v14, %v44_v8 }
   0x4   :  { %vm637_vm1 = vcmp.lt.s32.totalorder %v964_v1, %v635_v4  ;;  %v42_v6 = vld [vmem:[%s1100_s3] sm:$0xff]  ;;  %v27_v9 = vld [vmem:[%s1097_s0 + $0x8] sm:$0xff]  ;;  %v712_v12 = vsel %vm638_vm2, 1.0, %v914_v10 }
   0x5   :  { %v711_v11 = vsel %vm637_vm1, 1.0, %v914_v10  ;;  %v815_v13 = vpack.c.bf16 %v43_v7, %v42_v6  ;;  %659 = vst.msk [vmem:[%s1104_s7 + $0x8] sm:$0xff] %vm657_vm0, %v712_v12  ;;  %v46_v16 = vld [vmem:[%s1100_s3 + $0x20] sm:$0xff]  ;;  %v47_v17 = vld [vmem:[%s1100_s3 + $0x28] sm:$0xff] }
   0x6   :  { %658 = vst.msk [vmem:[%s1104_s7] sm:$0xff] %vm657_vm0, %v711_v11 }
   0x7   :  { %13 = vsyncpa [#allocation3], 0  ;;  %816 = vmatprep.subr.bf16.mxu0 %v815_v13  ;;  %34 = vperm.xlu0 %872, %v27_v9   ;;  %v884_v18 = vpack.i.bf16 %v712_v12, %v711_v11  ;;  %v823_v19 = vpack.c.bf16 %v47_v17, %v46_v16  ;;  %v48_v20 = vld [vmem:[%s1100_s3 + $0x30] sm:$0xff]  ;;  %v49_v21 = vld [vmem:[%s1100_s3 + $0x38] sm:$0xff]  ;;  %v28_v29 = vlaneseq  ;;  %vm50_vm3 = vcmask 523264   ;;  %s915_s27 = smov [#allocation2]  }
   0x8   :  { %818 = vmatpush3.bf16.msra.mxu0 %v815_v13  ;;  %v690_v22 = vld [vmem:[%s1101_s4 + $0x20] sm:$0xff]  ;;  %v691_v23 = vld [vmem:[%s1101_s4 + $0x28] sm:$0xff]  ;;  %v692_v24 = vld [vmem:[%s1101_s4 + $0x30] sm:$0xff]  ;;  %v827_v25 = vpack.c.bf16 %v49_v21, %v48_v20  ;;  %vm145_vm7 = vcmask 130048   ;;  %v227_v38 = vadd.s32 4294967295, %v964_v1  ;;  %v228_v39 = vadd.s32 4294967295, %v969_v3 }
   0x9   :  { %820 = vmatprep.subr.bf16.mxu0 %v819_v15  ;;  %v835_v26 = vpack.c.bf16 %v691_v23, %v690_v22  ;;  %v693_v27 = vld [vmem:[%s1101_s4 + $0x38] sm:$0xff]  ;;  %v1026_v30 = vand.u32 127, %v28_v29  ;;  %v135_v35 = vshrl.u32 %v28_v29, 7  ;;  %v512_v40 = vadd.s32 1, %v964_v1  ;;  %v251_v48 = vld [vmem:[%s1101_s4] sm:$0xff]  ;;  %v252_v49 = vld [vmem:[%s1101_s4 + $0x8] sm:$0xff] }
   0xa   :  { %v839_v28 = vpack.c.bf16 %v693_v27, %v692_v24  ;;  %v513_v41 = vadd.s32 1, %v969_v3  ;;  %vm229_vm8 = vcmp.ge.s32.totalorder %v227_v38, 0  ;;  %vm230_vm9 = vcmp.ge.s32.totalorder %v228_v39, 0  ;;  %v253_v61 = vld [vmem:[%s1101_s4 + $0x10] sm:$0xff]  ;;  %v254_v62 = vld [vmem:[%s1101_s4 + $0x18] sm:$0xff]  ;;  %v704_v0 = vld [vmem:[%s1101_s4 + $0x40] sm:$0xff] }
   0xb   :  { %885 = vperm.xlu0 %872, %v884_v18   ;;  %836 = vmatprep.subr.bf16.mxu1 %v835_v26  ;;  %v137_v36 = vadd.s32 4294967295, %v135_v35  ;;  %vm231_vm10 = vcmp.lt.s32.totalorder %v227_v38, 8  ;;  %vm232_vm11 = vcmp.lt.s32.totalorder %v228_v39, 8  ;;  %vm514_vm13 = vcmp.ge.s32.totalorder %v512_v40, 0  ;;  %v705_v1 = vld [vmem:[%s1101_s4 + $0x48] sm:$0xff]  ;;  %v706_v7 = vld [vmem:[%s1101_s4 + $0x50] sm:$0xff] }
   0xc   :  { %822 = vmatpush3.bf16.msra.mxu0 %v819_v15  ;;  %838 = vmatpush3.bf16.msra.mxu1 %v835_v26  ;;  %vm233_vm12 = vmand %vm229_vm8, %vm231_vm10  ;;  %vm515_vm14 = vcmp.ge.s32.totalorder %v513_v41, 0  ;;  %vm516_vm15 = vcmp.lt.s32.totalorder %v512_v40, 8  ;;  %vm517_vm0 = vcmp.lt.s32.totalorder %v513_v41, 8  ;;  %v843_v50 = vpack.c.bf16 %v252_v49, %v251_v48  ;;  %v707_v8 = vld [vmem:[%s1101_s4 + $0x58] sm:$0xff]  ;;  %v710_v20 = vld [vmem:[%s1102_s5] ss:$0 sm:$0xff] }
   0xd   :  { %824 = vmatprep.subr.bf16.mxu0 %v823_v19  ;;  %840 = vmatprep.subr.bf16.mxu1 %v839_v28  ;;  %vm139_vm6 = vcmp.eq.s32.totalorder %v1026_v30, %v137_v36  ;;  %vm234_vm1 = vmand %vm230_vm9, %vm232_vm11  ;;  %v688_v42 = vsel %vm233_vm12, 1.0, %v914_v10  ;;  %v136_v51 = vadd.s32 8, %v135_v35  ;;  %v423_v53 = vadd.s32 1, %v135_v35  ;;  %s665_s7 = sshll.u32 %s915_s27, 4  ;;  %s666_s7 = int_to_ptr.vmem [resolvable:$true] %s665_s7 }
   0xe   :  { %v684_v37 = vsel %vm139_vm6, 1.0, %v914_v10  ;;  %v689_v43 = vsel %vm234_vm1, 1.0, %v914_v10  ;;  %vm518_vm2 = vmand %vm514_vm13, %vm516_vm15  ;;  %v847_v63 = vpack.c.bf16 %v254_v62, %v253_v61  ;;  %v855_v2 = vpack.c.bf16 %v705_v1, %v704_v0  ;;  %s889_s28 = scalar_lea.vmem %s666_s7, 256  ;;  %p894_p1 = scmp.lt.s32.totalorder %s666_s7, %s666_s7 }
   0xf   :  { %v874_v44 = vpack.i.bf16 %v689_v43, %v688_v42  ;;  %v702_v45 = vsel %vm518_vm2, 1.0, %v914_v10  ;;  %v138_v52 = vadd.s32 4294967295, %v136_v51  ;;  %v424_v57 = vadd.s32 1, %v136_v51  ;;  %p890_p0 = scmp.ne.s32.totalorder %s666_s7, %s889_s28  ;;  %p895_p2 = scmp.lt.s32.totalorder %s889_s28, %s889_s28 }
  0x10   :  { %826 = vmatpush3.bf16.msra.mxu0 %v823_v19  ;;  %842 = vmatpush3.bf16.msra.mxu1 %v839_v28  ;;  %vm425_vm6 = vcmp.eq.s32.totalorder %v1026_v30, %v423_v53  ;;  %v859_v13 = vpack.c.bf16 %v707_v8, %v706_v7 }
  0x11   :  { %828 = vmatprep.subr.bf16.mxu0 %v827_v25  ;;  %875 = vperm.xlu1 %873, %v874_v44   ;;  %v698_v59 = vsel %vm425_vm6, 1.0, %v914_v10  ;;  %vm426_vm8 = vcmp.eq.s32.totalorder %v1026_v30, %v424_v57  ;;  %p896_p3 = por %p895_p2, %p894_p1 }
  0x12   :  { %844 = vmatprep.subr.bf16.mxu1 %v843_v50  ;;  %v699_v60 = vsel %vm426_vm8, 1.0, %v914_v10 }
  0x13   :  { %p897_p4 = pnand %p896_p3, %p890_p0 }
  0x14   :  { %830 = vmatpush3.bf16.msra.mxu0 %v827_v25 }
  0x81   :  { %v32_v31 = vpop.permute.xlu0 %31 }
  0x82   :  { %vm36_vm4 = vcmp.eq.s32.totalorder %v32_v31, %v1026_v30 }
  0x83   :  { %v680_v32 = vsel %vm36_vm4, 1.0, %v914_v10  ;;  %vm260_vm4 = vcmask 261120  }
  0x84   :  { %765 = vmatprep.mubr.msk.f32.mxu0 %vm50_vm3, %v680_v32 }
  0x86   :  { %v35_v33 = vpop.permute.xlu0 %34 }
  0x87   :  { %vm37_vm5 = vcmp.eq.s32.totalorder %v35_v33, %v1026_v30 }
  0x88   :  { %v681_v34 = vsel %vm37_vm5, 1.0, %v914_v10  ;;  %vm140_vm5 = vcmp.eq.s32.totalorder %v1026_v30, %v138_v52 }
  0x89   :  { %766 = vmatmul.mubr.msk.f32.vlgmr.msra.gmra.mrb[0].mxu0 %vm50_vm3, %v681_v34  ;;  %vm519_vm3 = vmand %vm515_vm14, %vm517_vm0  ;;  %v685_v58 = vsel %vm140_vm5, 1.0, %v914_v10 }
  0x8a   :  { %772 = vmatprep.mubr.msk.f32.mxu0 %vm145_vm7, %v684_v37  ;;  %v703_v46 = vsel %vm519_vm3, 1.0, %v914_v10  ;;  %v886_v21 = vpop.permute.xlu0 %885 }
  0x8b   :  { %v879_v47 = vpack.i.bf16 %v703_v46, %v702_v45  ;;  %v888_v26 = vunpack.i.h.bf16 %v886_v21  ;;  %v887_v28 = vunpack.i.l.bf16 %v886_v21 }
  0x8d   :  { %880 = vperm.xlu1 %873, %v879_v47  }
  0x90   :  { %v876_v3 = vpop.permute.xlu1 %875 }
  0x91   :  { %v877_v4 = vunpack.i.l.bf16 %v876_v3  ;;  %v878_v5 = vunpack.i.h.bf16 %v876_v3 }
 0x10c   :  { %v881_v9 = vpop.permute.xlu1 %880 }
 0x10d   :  { %v882_v14 = vunpack.i.l.bf16 %v881_v9  ;;  %v883_v18 = vunpack.i.h.bf16 %v881_v9 }
 0x15c   :  { %v767_v54 = vpop.f32.mrb[0].mxu0 }
 0x15d   :  { %v123_v55 = vpop.f32.mrb[1].mxu0 }
 0x15e   :  { %v831_v56 = vpack.c.bf16 %v767_v54, %v123_v55  ;;  %783 = vmatprep.mubr.msk.f32.mxu1 %vm260_vm4, %v123_v55 }
 0x15f   :  { %784 = vmatmul.mubr.msk.f32.vlgmr.msra.gmra.mrb[0].mxu1 %vm260_vm4, %v767_v54 }
 0x160   :  { %832 = vmatprep.subr.bf16.mxu0 %v831_v56  ;;  %846 = vmatpush3.bf16.msra.mxu1 %v843_v50 }
 0x161   :  { %834 = vmatpush3.bf16.msra.mxu0 %v831_v56  ;;  %848 = vmatprep.subr.bf16.mxu1 %v847_v63 }
 0x162   :  { %852 = vmatprep.subr.bf16.mxu0 %v831_v56 }
 0x164   :  { %773 = vmatmul.mubr.msk.f32.vlgmr.msra.gmra.mrb[2].mxu0 %vm145_vm7, %v685_v58  ;;  %850 = vmatpush3.bf16.msra.mxu1 %v847_v63 }
 0x165   :  { %854 = vmatpush3.bf16.msra.mxu0 %v831_v56  ;;  %801 = vmatprep.mubr.msk.f32.mxu0 %vm145_vm7, %v698_v59 }
 0x166   :  { %856 = vmatprep.subr.bf16.mxu1 %v855_v2 }
 0x168   :  { %802 = vmatmul.mubr.msk.f32.vlgmr.msra.gmra.mrb[4].mxu0 %vm145_vm7, %v699_v60 }
 0x237   :  { %v774_v6 = vpop.f32.mrb[2].mxu0 }
 0x238   :  { %v218_v10 = vpop.f32.mrb[3].mxu0  ;;  %v250_v12 = vmul.f32 %v878_v5, %v774_v6 }
 0x239   :  { %v249_v11 = vmul.f32 %v877_v4, %v218_v10 }
 0x23b   :  { %794 = vmatprep.mubr.msk.f32.mxu1 %vm260_vm4, %v249_v11  ;;  %v803_v15 = vpop.f32.mrb[4].mxu0 }
 0x23c   :  { %795 = vmatmul.mubr.msk.f32.vlgmr.msra.gmra.mrb[0].mxu1 %vm260_vm4, %v250_v12  ;;  %v503_v16 = vpop.f32.mrb[5].mxu0  ;;  %v535_v19 = vmul.f32 %v883_v18, %v803_v15 }
 0x23d   :  { %v534_v17 = vmul.f32 %v882_v14, %v503_v16  ;;  %858 = vmatpush3.bf16.msra.mxu1 %v855_v2 }
 0x23e   :  { %860 = vmatprep.subr.bf16.mxu1 %v859_v13 }
 0x23f   :  { %812 = vmatprep.mubr.msk.f32.mxu1 %vm260_vm4, %v534_v17 }
 0x241   :  { %862 = vmatpush3.bf16.msra.mxu1 %v859_v13 }
 0x244   :  { %813 = vmatmul.mubr.msk.f32.vlgmr.msra.gmra.mrb[0].mxu1 %vm260_vm4, %v535_v19 }
 0x317   :  { %v814_v22 = vpop.f32.mrb[0].mxu1 }
 0x318   :  { %v632_v23 = vadd.f32 %v814_v22, %v710_v20  ;;  %v613_v24 = vpop.f32.mrb[1].mxu1 }
 0x319   :  { %v631_v25 = vadd.f32 %v710_v20, %v613_v24 }
 0x31a   :  { %v634_v27 = vmax.f32 %v632_v23, 0.0 }
 0x31b   :  { %v633_v29 = vmax.f32 %v631_v25, 0.0 }
 0x31c   :  { %v654_v30 = vmul.f32 %v888_v26, %v634_v27 }
 0x31d   :  { %v653_v31 = vmul.f32 %v887_v28, %v633_v29 }
 0x31e   :  { %656 = vst [vmem:[#allocation2 + $0x8] sm:$0xff] %v654_v30 }
 0x31f   :  { %655 = vst [vmem:[#allocation2] sm:$0xff] %v653_v31 }
 0x320   :  { %900 = shalt.err (!%p897_p4)
}
 0x321   :  { %s901_s30 = scalar_lea.hbm %s1103_s6, 256 }
 0x322   :  { %p902_p5 = scmp.ne.s32.totalorder %s1103_s6, %s901_s30  ;;  %p905_p6 = scmp.lt.u32.totalorder %s901_s30, %s1103_s6 }
 0x324   :  { %p907_p7 = pnand %p905_p6, %p902_p5 }
 0x326   :  { %910 = shalt.err (!%p907_p7)
}
 0x327   :  { %s916_s12 = smov 128   ;;  %s917_s1 = smov 8  }
 0x328   :  { %671 = dma.vmem_to_hbm [thread:$0]  %s666_s7, 256, %s1103_s6, [#allocation3], %s916_s12, %s916_s12, %s917_s1  }
 0x329   :  { %911 = dma.done.wait [#allocation3], 256  }
 0x32a   :  { %912 = vsyncadd [#allocation3], 4294967040 }
 0x32b   :  { %679 = vsyncpa [#allocation3], 1 }

</bundles_post_ra>
